<compile_context>
chip_gen: v5e
topology: v5e:2x2
jax: 0.10.0
libtpu: 0.0.40
codegen_flags: <defaults>
</compile_context>

<pallas_src>
import functools

import jax
import jax.numpy as jnp
from jax.experimental import pallas as pl
from jax.experimental.pallas import tpu as pltpu


def _round_up(x, m):
    return ((x + m - 1) // m) * m


def _tabular_embedder_kernel(packed_ref, w1_ref, b1_ref, waug_ref, addc_ref, o_ref,
                             *, n_cat, n_num, d, h_dim, g, c_pad):
    # packed_ref: (c_pad + 3*g, TB) bf16, batch-last:
    #   rows [0, n_cat*d)               pre-gathered categorical embeddings
    #   rows [c_pad, c_pad+n_num)       numerical values
    #   rows [c_pad+g, +n_num)          [MASK] flags (exact 0/1)
    #   rows [c_pad+2g, +n_num)         [NULL] flags (exact 0/1)
    #   (all group boundaries 8-sublane aligned; padding rows are zero)
    # w1_ref, b1_ref: (n_num, h_dim) f32  per-column Linear(1, H) weight / bias
    # waug_ref: (n_num*d, n_num*h_dim + 3*g) f32 augmented block-diagonal weight
    #   [ blockdiag(w2_j^T) | diag(b2_j+pos_j) | diag(mask_j+pos_j) | diag(null_j+pos_j) ]
    # addc_ref: ((1+n_cat)*d, 1) f32  [ cls+pos_0 ; pos rows of the cat tokens ]
    # o_ref: (T1*d, TB) bf16
    tb = o_ref.shape[-1]
    ncd = n_cat * d
    off_x = c_pad
    off_m = c_pad + g
    off_n = c_pad + 2 * g

    # Cast-on-load: stream bf16, compute in f32 (v5e VPU has no bf16 ALUs).
    cat = packed_ref[0:ncd, :].astype(jnp.float32)
    x = packed_ref[off_x:off_x + n_num, :].astype(jnp.float32)
    mf_g = packed_ref[off_m:off_m + g, :].astype(jnp.float32)
    nf_g = packed_ref[off_n:off_n + g, :].astype(jnp.float32)
    mf = mf_g[0:n_num, :]
    nf = nf_g[0:n_num, :]

    # Flags are exact 0/1 (thresholded in the wrapper); NULL wins over MASK,
    # matching the PyTorch write order normal -> mask -> null.
    normal = (1.0 - mf) * (1.0 - nf)          # (n_num, tb)  zeroes the MLP path
    normal_g = (1.0 - mf_g) * (1.0 - nf_g)    # (g, tb) padding rows = 1, but their waug cols are 0
    monly_g = mf_g * (1.0 - nf_g)             # (g, tb)

    # Linear(1, H) + ReLU for all numerical columns at once: (n_num, H, tb).
    w1 = w1_ref[...]
    b1 = b1_ref[...]
    h = jnp.maximum(x[:, None, :] * w1[:, :, None] + b1[:, :, None], 0.0)
    h = h * normal[:, None, :]                # masked/null entries contribute nothing
    h_flat = h.reshape(n_num * h_dim, tb)     # layout-preserving (h_dim % 8 == 0)

    # Single fused MXU matmul: per-column Linear(H, D) + (b2 + pos) +
    # [MASK]/[NULL] embedding selection (pos folded in), via the augmented
    # block-diagonal weight.  All rhs group boundaries are multiples of 8 ->
    # pure vreg placement, no cross-sublane shifts.
    rhs = jnp.concatenate([h_flat, normal_g, monly_g, nf_g], axis=0)
    num_rows = jnp.dot(waug_ref[...], rhs, preferred_element_type=jnp.float32)

    addc = addc_ref[...]
    cls_rows = jnp.broadcast_to(addc[0:d, :], (d, tb))   # cls + pos_0 (pre-added host-side)
    cat_rows = cat + addc[d:, :]                          # cat + pos_cat
    # Single unmasked full-tile, lane-dense store.
    o_ref[...] = jnp.concatenate([cls_rows, cat_rows, num_rows],
                                 axis=0).astype(o_ref.dtype)


def prepare_tabular_embedder_params(w1, b1, w2, b2, mask_emb, null_emb,
                                    cls_token, pos_emb, n_cat):
    """Parameter-only preprocessing. Call ONCE and reuse across forwards."""
    n_num, h_dim = w1.shape
    d = int(cls_token.reshape(-1).shape[0])
    t1 = int(pos_emb.shape[0])
    assert t1 == 1 + n_cat + n_num
    assert h_dim % 8 == 0, "hidden_dim must be a multiple of 8 (layout-preserving reshape)"
    g = _round_up(n_num, 8)            # 8-aligned flag-group width
    c_pad = _round_up(n_cat * d, 8)    # 8-aligned categorical group width

    f32 = jnp.float32
    w2 = w2.astype(f32)
    pos_num = pos_emb[1 + n_cat:].astype(f32)              # (n_num, d)

    # blockdiag(w2_j^T): (n_num*d, n_num*h_dim), built without per-column scatters.
    eye = jnp.eye(n_num, dtype=f32)
    main = jnp.einsum('jk,jhd->jdkh', eye, w2).reshape(n_num * d, n_num * h_dim)

    def diag_cols(vecs):                                    # (n_num, d) -> (n_num*d, g)
        cols = jnp.zeros((n_num, d, g), f32)
        cols = cols.at[jnp.arange(n_num), :, jnp.arange(n_num)].set(vecs.astype(f32))
        return cols.reshape(n_num * d, g)

    # Positional embedding of the numerical tokens is folded into all three
    # selection columns (exactly one of normal/mask/null is 1 per entry).
    # TODO(synk): at n_num >~ 32 split numeric columns into groups (second grid
    # axis) instead of scaling this block-diagonal weight quadratically.
    waug = jnp.concatenate([main,
                            diag_cols(b2 + pos_num),
                            diag_cols(mask_emb + pos_num),
                            diag_cols(null_emb + pos_num)], axis=1)

    addc = jnp.concatenate(
        [(cls_token.reshape(d) + pos_emb[0]).reshape(d, 1),
         pos_emb[1:1 + n_cat].reshape(n_cat * d, 1)], axis=0).astype(f32)

    return dict(w1=w1.astype(f32), b1=b1.astype(f32), waug=waug, addc=addc,
                n_cat=n_cat, n_num=n_num, d=d, h_dim=h_dim, g=g, c_pad=c_pad, t1=t1)


def tabular_embedder(cat_tables, cat_indices, num_vals, mask_flags, null_flags,
                     prep, *, block_b=512, batch_last=False,
                     single_buffer_params=False,
                     stream_dtype=jnp.bfloat16, out_dtype=jnp.bfloat16):
    n_cat, n_num = prep['n_cat'], prep['n_num']
    d, h_dim, g, c_pad, t1 = prep['d'], prep['h_dim'], prep['g'], prep['c_pad'], prep['t1']
    w1, b1, waug, addc = prep['w1'], prep['b1'], prep['waug'], prep['addc']
    # TODO(synk): the module's categorical-only / numerical-only code paths are
    # not implemented; both column kinds are assumed present.
    assert n_cat >= 1 and n_num >= 1
    assert block_b % 128 == 0
    B = num_vals.shape[0]

    # Large lane-dense blocks (amortize ~0.35us/step), but keep >= 4 grid steps
    # when the batch allows it (>= 2 per TensorCore on v7x megacore).
    block_b = max(128, min(block_b, _round_up(pl.cdiv(B, 4), 128)))
    pad = (-B) % block_b
    Bp = B + pad

    # Build the single packed, batch-last (lane-dense) bf16 input directly from
    # the gather -- no (B, n_cat*D) intermediate + HBM transpose, one input DMA
    # per grid step.  Flags are thresholded to exact 0/1.
    cat_rows = [tbl.astype(stream_dtype).T[:, cat_indices[:, c]]
                for c, tbl in enumerate(cat_tables)]          # each (d, B)
    x_t = num_vals.astype(stream_dtype).T                      # (n_num, B)
    mf_t = (mask_flags > 0.5).astype(stream_dtype).T
    nf_t = (null_flags > 0.5).astype(stream_dtype).T

    def zrows(n):
        return jnp.zeros((n, B), stream_dtype)

    packed = jnp.concatenate(
        cat_rows + [zrows(c_pad - n_cat * d),
                    x_t, zrows(g - n_num),
                    mf_t, zrows(g - n_num),
                    nf_t, zrows(g - n_num)], axis=0)           # (c_pad + 3g, B)
    if pad:
        packed = jnp.pad(packed, ((0, 0), (0, pad)))

    rows_in = c_pad + 3 * g
    rows_out = t1 * d
    k_aug = n_num * h_dim + 3 * g

    kernel = functools.partial(_tabular_embedder_kernel,
                               n_cat=n_cat, n_num=n_num, d=d, h_dim=h_dim,
                               g=g, c_pad=c_pad)

    def const_spec(shape):
        # At production n_num, waug grows ~quadratically; single-buffer the
        # constant-index parameter blocks on v7x (64 MiB VMEM).
        if single_buffer_params:
            return pl.BlockSpec(shape, lambda i: (0, 0), pipeline_mode=pl.Buffered(1))
        return pl.BlockSpec(shape, lambda i: (0, 0))

    # Working-set estimate; raise the scoped VMEM limit only when it matters
    # (v5e scoped default 16 MiB, v6e/v7x 32 MiB).
    in_b = jnp.dtype(stream_dtype).itemsize
    out_b = jnp.dtype(out_dtype).itemsize
    vmem_est = (2 * rows_in * block_b * in_b
                + 2 * rows_out * block_b * out_b
                + (rows_in + 2 * n_num * h_dim + 3 * g + n_num * d + 2 * rows_out)
                * block_b * 4
                + 2 * (waug.size + w1.size + b1.size + addc.size) * 4)
    vmem_limit = int(vmem_est * 1.25) if vmem_est > (14 << 20) else None

    out_t = pl.pallas_call(
        kernel,
        out_shape=jax.ShapeDtypeStruct((rows_out, Bp), out_dtype),
        grid=(Bp // block_b,),
        in_specs=[
            pl.BlockSpec((rows_in, block_b), lambda i: (0, i)),
            const_spec((n_num, h_dim)),
            const_spec((n_num, h_dim)),
            const_spec((n_num * d, k_aug)),
            const_spec(((1 + n_cat) * d, 1)),
        ],
        out_specs=pl.BlockSpec((rows_out, block_b), lambda i: (0, i)),
        compiler_params=pltpu.CompilerParams(
            dimension_semantics=("parallel",),
            vmem_limit_bytes=vmem_limit),
    )(packed, w1, b1, waug, addc)

    out_t = out_t[:, :B]
    if batch_last:
        # Preferred downstream layout: (T1*D, B), token-major / dim-minor rows.
        return out_t
    # Module-natural layout; prefer batch_last=True downstream to skip this HBM
    # transpose (it costs about as much bandwidth as the kernel's output write).
    return out_t.T.reshape(B, t1, d)


def reference(cat_embeds, num_vals, mask_flags, null_flags,
              w1, b1, w2, b2, mask_emb, null_emb, cls_token, pos_emb):
    h = jnp.maximum(num_vals[:, :, None] * w1[None] + b1[None], 0.0)
    mlp = jnp.einsum('bjh,jhd->bjd', h, w2) + b2[None]
    num_final = jnp.where(null_flags[:, :, None] > 0.5, null_emb[None],
                          jnp.where(mask_flags[:, :, None] > 0.5, mask_emb[None], mlp))
    B, _, D = cat_embeds.shape
    cls_tok = jnp.broadcast_to(cls_token.reshape(1, 1, D), (B, 1, D))
    tokens = jnp.concatenate([cls_tok, cat_embeds, num_final], axis=1)
    return tokens + pos_emb[None]


if __name__ == "__main__":
    # Small synthetic configuration consistent with the module:
    #   2 categorical columns (vocab sizes 6 and 9, incl. [MASK]/[NULL] classes),
    #   3 numerical columns, dimensao=4, hidden_dim=32.
    B = 2048       # 4 grid steps of 512 -> lane-dense blocks, >=2 steps/TC on v7x
    D = 4          # dimensao
    H = 32         # hidden_dim
    n_cat = 2
    n_num = 3
    T1 = 1 + n_cat + n_num
    vocab_sizes = [6, 9]

    key = jax.random.PRNGKey(0)
    keys = jax.random.split(key, 16)

    # Parameters (deterministic synthetic init; shapes per nn.Module __init__).
    cat_tables = [
        jax.random.normal(keys[0], (vocab_sizes[0], D), jnp.float32),
        jax.random.normal(keys[1], (vocab_sizes[1], D), jnp.float32),
    ]
    w1 = jax.random.normal(keys[2], (n_num, H), jnp.float32) * 0.3     # Linear(1, H)
    b1 = jax.random.normal(keys[3], (n_num, H), jnp.float32) * 0.1
    w2 = jax.random.normal(keys[4], (n_num, H, D), jnp.float32) * 0.2  # Linear(H, D)
    b2 = jax.random.normal(keys[5], (n_num, D), jnp.float32) * 0.1
    mask_emb = jax.random.normal(keys[6], (n_num, D), jnp.float32)     # {col}_mask params
    null_emb = jax.random.normal(keys[7], (n_num, D), jnp.float32)     # {col}_null params
    cls_token = jax.random.normal(keys[8], (1, D), jnp.float32)
    pos_emb = jax.random.normal(keys[9], (T1, D), jnp.float32)

    # Inputs: label-encoded categorical indices + numerical values + flags.
    # TODO(synk): pandas DataFrame / LabelEncoder string handling has no Pallas
    # equivalent; indices are generated directly as the encoder's output would be.
    cat_indices = jnp.stack(
        [jax.random.randint(keys[10], (B,), 0, vocab_sizes[0]),
         jax.random.randint(keys[11], (B,), 0, vocab_sizes[1])], axis=1)
    num_vals = jax.random.normal(keys[12], (B, n_num), jnp.float32)
    mask_flags = (jax.random.uniform(keys[13], (B, n_num)) < 0.2).astype(jnp.float32)
    null_flags = (jax.random.uniform(keys[14], (B, n_num)) < 0.2).astype(jnp.float32)

    # Parameter preprocessing hoisted out of the per-call path (done once).
    prep = prepare_tabular_embedder_params(w1, b1, w2, b2, mask_emb, null_emb,
                                           cls_token, pos_emb, n_cat=n_cat)

    out = tabular_embedder(cat_tables, cat_indices, num_vals, mask_flags, null_flags,
                           prep, block_b=512)
    out = jax.block_until_ready(out)

    # Reference on the same bf16-rounded streamed values (flags are exact in bf16).
    cat_embeds = jnp.stack([cat_tables[0][cat_indices[:, 0]],
                            cat_tables[1][cat_indices[:, 1]]], axis=1)
    cat_bf = cat_embeds.astype(jnp.bfloat16).astype(jnp.float32)
    num_bf = num_vals.astype(jnp.bfloat16).astype(jnp.float32)
    ref = reference(cat_bf, num_bf, mask_flags, null_flags,
                    w1, b1, w2, b2, mask_emb, null_emb, cls_token, pos_emb)

    assert out.shape == (B, T1, D)
    assert jnp.allclose(out.astype(jnp.float32), ref, atol=5e-2, rtol=5e-2)
    print("KERNEL_OK")
</pallas_src>

<mosaic_0001>
module attributes {stable_mosaic.version = 11 : i64} {
  func.func @_tabular_embedder_kernel(%arg0: i32, %arg1: memref<32x512xbf16, #tpu.memory_space<vmem>>, %arg2: memref<3x32xf32, #tpu.memory_space<vmem>>, %arg3: memref<3x32xf32, #tpu.memory_space<vmem>>, %arg4: memref<12x120xf32, #tpu.memory_space<vmem>>, %arg5: memref<12x1xf32, #tpu.memory_space<vmem>>, %arg6: memref<24x512xbf16, #tpu.memory_space<vmem>>) attributes {dimension_semantics = [#tpu.dimension_semantics<parallel>], iteration_bounds = array<i64: 4>, scalar_prefetch = 0 : i64, scratch_operands = 0 : i64, tpu.core_type = #tpu.core_type<tc>, window_params = [{transform_indices = @transform_0, window_bounds = array<i64: 32, 512>}, {pipeline_mode = #tpu.pipeline_mode<synchronous>, transform_indices = @transform_1, window_bounds = array<i64: 3, 32>}, {pipeline_mode = #tpu.pipeline_mode<synchronous>, transform_indices = @transform_2, window_bounds = array<i64: 3, 32>}, {pipeline_mode = #tpu.pipeline_mode<synchronous>, transform_indices = @transform_3, window_bounds = array<i64: 12, 120>}, {pipeline_mode = #tpu.pipeline_mode<synchronous>, transform_indices = @transform_4, window_bounds = array<i64: 12, 1>}, {transform_indices = @transform_5, window_bounds = array<i64: 24, 512>}]} {
    %c0 = arith.constant 0 : index
    %c0_0 = arith.constant 0 : index
    %0 = vector.load %arg1[%c0, %c0_0] : memref<32x512xbf16, #tpu.memory_space<vmem>>, vector<8x512xbf16>
    %1 = arith.extf %0 : vector<8x512xbf16> to vector<8x512xf32>
    %c8 = arith.constant 8 : index
    %c0_1 = arith.constant 0 : index
    %2 = vector.load %arg1[%c8, %c0_1] : memref<32x512xbf16, #tpu.memory_space<vmem>>, vector<3x512xbf16>
    %3 = arith.extf %2 : vector<3x512xbf16> to vector<3x512xf32>
    %c16 = arith.constant 16 : index
    %c0_2 = arith.constant 0 : index
    %4 = vector.load %arg1[%c16, %c0_2] : memref<32x512xbf16, #tpu.memory_space<vmem>>, vector<8x512xbf16>
    %5 = arith.extf %4 : vector<8x512xbf16> to vector<8x512xf32>
    %c24 = arith.constant 24 : index
    %c0_3 = arith.constant 0 : index
    %6 = vector.load %arg1[%c24, %c0_3] : memref<32x512xbf16, #tpu.memory_space<vmem>>, vector<8x512xbf16>
    %7 = arith.extf %6 : vector<8x512xbf16> to vector<8x512xf32>
    %8 = vector.extract_strided_slice %5 {offsets = [0, 0], sizes = [3, 512], strides = [1, 1]} : vector<8x512xf32> to vector<3x512xf32>
    %9 = vector.extract_strided_slice %7 {offsets = [0, 0], sizes = [3, 512], strides = [1, 1]} : vector<8x512xf32> to vector<3x512xf32>
    %cst = arith.constant 1.000000e+00 : f32
    %10 = vector.broadcast %cst : f32 to vector<3x512xf32>
    %11 = arith.subf %10, %8 : vector<3x512xf32>
    %cst_4 = arith.constant 1.000000e+00 : f32
    %12 = vector.broadcast %cst_4 : f32 to vector<3x512xf32>
    %13 = arith.subf %12, %9 : vector<3x512xf32>
    %14 = arith.mulf %11, %13 : vector<3x512xf32>
    %cst_5 = arith.constant 1.000000e+00 : f32
    %15 = vector.broadcast %cst_5 : f32 to vector<8x512xf32>
    %16 = arith.subf %15, %5 : vector<8x512xf32>
    %cst_6 = arith.constant 1.000000e+00 : f32
    %17 = vector.broadcast %cst_6 : f32 to vector<8x512xf32>
    %18 = arith.subf %17, %7 : vector<8x512xf32>
    %19 = arith.mulf %16, %18 : vector<8x512xf32>
    %cst_7 = arith.constant 1.000000e+00 : f32
    %20 = vector.broadcast %cst_7 : f32 to vector<8x512xf32>
    %21 = arith.subf %20, %7 : vector<8x512xf32>
    %22 = arith.mulf %5, %21 : vector<8x512xf32>
    %c0_8 = arith.constant 0 : index
    %c0_9 = arith.constant 0 : index
    %23 = vector.load %arg2[%c0_8, %c0_9] : memref<3x32xf32, #tpu.memory_space<vmem>>, vector<3x32xf32>
    %c0_10 = arith.constant 0 : index
    %c0_11 = arith.constant 0 : index
    %24 = vector.load %arg3[%c0_10, %c0_11] : memref<3x32xf32, #tpu.memory_space<vmem>>, vector<3x32xf32>
    %25 = vector.shape_cast %3 : vector<3x512xf32> to vector<3x1x512xf32>
    %26 = vector.shape_cast %23 : vector<3x32xf32> to vector<3x32x1xf32>
    %27 = vector.broadcast %25 : vector<3x1x512xf32> to vector<3x32x512xf32>
    %28 = vector.broadcast %26 : vector<3x32x1xf32> to vector<3x32x512xf32>
    %29 = arith.mulf %27, %28 : vector<3x32x512xf32>
    %30 = vector.shape_cast %24 : vector<3x32xf32> to vector<3x32x1xf32>
    %31 = vector.broadcast %30 : vector<3x32x1xf32> to vector<3x32x512xf32>
    %32 = arith.addf %29, %31 : vector<3x32x512xf32>
    %cst_12 = arith.constant 0.000000e+00 : f32
    %33 = vector.broadcast %cst_12 : f32 to vector<3x32x512xf32>
    %34 = arith.maximumf %32, %33 : vector<3x32x512xf32>
    %35 = vector.shape_cast %14 : vector<3x512xf32> to vector<3x1x512xf32>
    %36 = vector.broadcast %35 : vector<3x1x512xf32> to vector<3x32x512xf32>
    %37 = arith.mulf %34, %36 : vector<3x32x512xf32>
    %38 = vector.shape_cast %37 : vector<3x32x512xf32> to vector<96x512xf32>
    %39 = tpu.concatenate %38, %19, %22, %7 in 0 : vector<96x512xf32>, vector<8x512xf32>, vector<8x512xf32>, vector<8x512xf32> -> vector<120x512xf32>
    %c0_13 = arith.constant 0 : index
    %c0_14 = arith.constant 0 : index
    %40 = vector.load %arg4[%c0_13, %c0_14] : memref<12x120xf32, #tpu.memory_space<vmem>>, vector<12x120xf32>
    %cst_15 = arith.constant dense<0.000000e+00> : vector<12x512xf32>
    %41 = tpu.matmul %40, %39, %cst_15 {dimension_numbers = #tpu.dot_dimension_numbers<[1], [0], [0], [1], [0, 0, 1, 1], [], []>} : vector<12x120xf32>, vector<120x512xf32>, vector<12x512xf32> -> vector<12x512xf32>
    %c0_16 = arith.constant 0 : index
    %c0_17 = arith.constant 0 : index
    %42 = vector.load %arg5[%c0_16, %c0_17] : memref<12x1xf32, #tpu.memory_space<vmem>>, vector<12x1xf32>
    %43 = vector.extract_strided_slice %42 {offsets = [0, 0], sizes = [4, 1], strides = [1, 1]} : vector<12x1xf32> to vector<4x1xf32>
    %44 = vector.shape_cast %43 : vector<4x1xf32> to vector<4x1xf32>
    %45 = vector.broadcast %44 : vector<4x1xf32> to vector<4x512xf32>
    %46 = vector.extract_strided_slice %42 {offsets = [4, 0], sizes = [8, 1], strides = [1, 1]} : vector<12x1xf32> to vector<8x1xf32>
    %47 = vector.broadcast %46 : vector<8x1xf32> to vector<8x512xf32>
    %48 = arith.addf %1, %47 : vector<8x512xf32>
    %49 = tpu.concatenate %45, %48, %41 in 0 : vector<4x512xf32>, vector<8x512xf32>, vector<12x512xf32> -> vector<24x512xf32>
    %50 = arith.truncf %49 : vector<24x512xf32> to vector<24x512xbf16>
    %c0_18 = arith.constant 0 : index
    %c0_19 = arith.constant 0 : index
    %51 = vector.load %arg6[%c0_18, %c0_19] : memref<24x512xbf16, #tpu.memory_space<vmem>>, vector<24x512xbf16>
    tpu.vector_store %arg6[%c0_18, %c0_19], %50 {strides = array<i32>} : memref<24x512xbf16, #tpu.memory_space<vmem>>, vector<24x512xbf16>,
    return
  }
  func.func @transform_0(%arg0: i32) -> (i32, i32) {
    %c0_i32 = arith.constant 0 : i32
    %c0_i32_0 = arith.constant 0 : i32
    return %c0_i32, %arg0 : i32, i32
  }
  func.func @transform_1(%arg0: i32) -> (i32, i32) {
    %c0_i32 = arith.constant 0 : i32
    %c0_i32_0 = arith.constant 0 : i32
    %c0_i32_1 = arith.constant 0 : i32
    return %c0_i32, %c0_i32_0 : i32, i32
  }
  func.func @transform_2(%arg0: i32) -> (i32, i32) {
    %c0_i32 = arith.constant 0 : i32
    %c0_i32_0 = arith.constant 0 : i32
    %c0_i32_1 = arith.constant 0 : i32
    return %c0_i32, %c0_i32_0 : i32, i32
  }
  func.func @transform_3(%arg0: i32) -> (i32, i32) {
    %c0_i32 = arith.constant 0 : i32
    %c0_i32_0 = arith.constant 0 : i32
    %c0_i32_1 = arith.constant 0 : i32
    return %c0_i32, %c0_i32_0 : i32, i32
  }
  func.func @transform_4(%arg0: i32) -> (i32, i32) {
    %c0_i32 = arith.constant 0 : i32
    %c0_i32_0 = arith.constant 0 : i32
    %c0_i32_1 = arith.constant 0 : i32
    return %c0_i32, %c0_i32_0 : i32, i32
  }
  func.func @transform_5(%arg0: i32) -> (i32, i32) {
    %c0_i32 = arith.constant 0 : i32
    %c0_i32_0 = arith.constant 0 : i32
    return %c0_i32, %arg0 : i32, i32
  }
}

</mosaic_0001>

<bundles_post_ra>
// kernel: tpu_custom_call.1
= control target key start
LH: loop header
LB: loop body
LE: loop exit
PB: predicated region body
PF: predicated region fallthrough
CT: control target
= control target key end

     0   :  { %s1782_s0 = inlined_call_operand.hbm [shape: bf16[32,2048], index: 0, kind: input, shape index: {}]   ;;  %s1783_s1 = inlined_call_operand.hbm [shape: f32[3,32], index: 1, kind: input, shape index: {}]   ;;  %s1784_s2 = inlined_call_operand.hbm [shape: f32[3,32], index: 2, kind: input, shape index: {}]   ;;  %s1785_s3 = inlined_call_operand.vmem [shape: f32[12,120], index: 3, kind: input, shape index: {}]   ;;  %s1786_s4 = inlined_call_operand.vmem [shape: f32[12,1], index: 4, kind: input, shape index: {}]   ;;  %s1787_s5 = inlined_call_operand.hbm [shape: bf16[24,2048], index: 5, kind: output, shape index: {}]  }
   0x1   :  { %1788 = sst [smem:[#allocation12_spill]] %s1783_s1 }
   0x2   :  { %1789 = sst [smem:[#allocation13_spill]] %s1784_s2 }
   0x3   :  { %10 = vsyncpa [#allocation3], 0 }
   0x4   :  { %12 = vsyncpa [#allocation3 + $0x1], 0 }
   0x5   :  { %13 = vsyncpa [#allocation6], 0 }
   0x6   :  { %14 = vsyncpa [#allocation4], 0 }
   0x7   :  { %16 = vsyncpa [#allocation4 + $0x1], 0  ;;  %s1361_s18 = smov 0   ;;  %s1363_s19 = smov 0  }
   0x8   :  { %s1365_s20 = smov 0   ;;  %s1367_s21 = smov 0  }
   0x9 LB: > { %s1382_s22 = sadd.s32 4294967295, %s1320_s21   ;;  %s1041_s23 = sadd.s32 4294967294, %s1320_s21   ;;  %s1320_s21 = sphi %s1367_s21, %s1801_s21   ;;  %s1316_s20 = sphi %s1365_s20, %s1800_s20   ;;  %s1312_s19 = sphi %s1363_s19, %s1799_s19   ;;  %s1308_s18 = sphi %s1361_s18, %s1798_s18  }
   0xa   : > { %s1386_s24 = sadd.s32 1, %s1320_s21   ;;  %s29_s25 = sadd.s32 1, %s1316_s20 }
   0xb   : > { %s26_s26 = ssub.s32 %s1320_s21, %s1386_s24  ;;  %p36_p0 = scmp.ne.s32.totalorder %s1316_s20, %s1312_s19 }
   0xc   : > { %p27_p1 = scmp.eq.s32.totalorder %s26_s26, 0  ;;  %p37_p2 = scmp.eq.s32.totalorder %s1320_s21, 0 }
   0xd   : > { %p42_p3 = scmp.ne.s32.totalorder %s1312_s19, %s1308_s18  ;;  %p43_p4 = scmp.eq.s32.totalorder %s1382_s22, 0 }
   0xe   : > { %s1398_s27 = scalar_select %p27_p1, %s1316_s20, %s29_s25  }
   0xf   : > { %p1400_p5 = por %p37_p2, %p36_p0  ;;  %p1406_p6 = por %p43_p4, %p42_p3 }
  0x10   : > { %p150_p7 = scmp.eq.s32.totalorder %s1382_s22, 3  ;;  %p156_p8 = scmp.eq.s32.totalorder %s1041_s23, 3 }
  0x11   : > { %p1042_p9 = scmp.ge.s32.totalorder %s1320_s21, 1  ;;  %p163_p10 = scmp.lt.s32.totalorder %s1320_s21, 5 }
  0x12   : > { %p1413_p11 = por %p150_p7, %p36_p0  ;;  %p1417_p12 = por %p156_p8, %p42_p3 }
  0x13   : > { %p1421_p13 = pnand %p1042_p9, %p163_p10  ;;  %s1795_s1 = sld [smem:[#allocation12_spill]] }
  0x14   : > { %s1322_s11 = smov [#allocation5]   ;;  %p1097_p2 = scmp.lt.s32.totalorder %s1320_s21, 4 }
  0x15   : > { %p1080_p1 = pneg %p1421_p13  ;;  %s177_s12 = sshll.u32 %s1322_s11, 4  ;;  %s178_s12 = int_to_ptr.vmem [resolvable:$true] %s177_s12 }
  0x16   : > { %s1796_s2 = sld [smem:[#allocation13_spill]]  ;;  %p1438_p3 = pnand %p1097_p2, %p1400_p5 }
  0x17   : > { %p1081_p0 = pnand %p1080_p1, %p43_p4  ;;  %s1323_s17 = smov [#allocation7]  }
  0x18   : > { %s189_s23 = sshll.u32 %s1323_s17, 4  ;;  %s206_s25 = sand.u32 1, %s1316_s20   ;;  %s190_s23 = int_to_ptr.vmem [resolvable:$true] %s189_s23 }
  0x19   : > { %s175_s10 = sshll.u32 %s1795_s1, 4  ;;  %s1046_s26 = sshll.u32 %s206_s25, 6  ;;  %s176_s10 = int_to_ptr.hbm [resolvable:$true] %s175_s10 }
  0x1a   : > { %1083 = dma.hbm_to_vmem [thread:$0]  (!%p1081_p0), %s176_s10, 64, %s178_s12, [#allocation6]  }
  0x1b   : > { %s1065_s8 = sshll.u32 %s1320_s21, 4  ;;  %s210_s14 = scalar_lea.vmem [#allocation2], %s1046_s26 }
  0x1c   : > { %s187_s15 = sshll.u32 %s1796_s2, 4  ;;  %s215_s13 = scalar_lea.hbm %s1782_s0, %s1065_s8  ;;  %s188_s15 = int_to_ptr.hbm [resolvable:$true] %s187_s15 }
  0x1d   : > { %1086 = dma.hbm_to_vmem [thread:$0]  (!%p1081_p0), %s188_s15, 64, %s190_s23, [#allocation6]  }
  0x1e   : > { %s218_s1 = sshll.u32 %s210_s14, 4  ;;  %s216_s10 = sshll.u32 %s215_s13, 4  ;;  %s219_s1 = int_to_ptr.vmem [resolvable:$true] %s218_s1  ;;  %s217_s10 = int_to_ptr.hbm [resolvable:$true] %s216_s10 }
  0x1f   : > { %s207_s28 = scalar_lea.sflag [#allocation3], %s206_s25  ;;  %s1220_s12 = sshra.s32 %s217_s10, 4  ;;  %s1221_s12 = int_to_ptr.hbm [resolvable:$true] %s1220_s12 }
  0x20   : > { %s1222_s2 = scalar_lea.hbm %s1221_s12, 64  ;;  %p1224_p7 = pneg %p1438_p3 }
  0x21   : > { %p1223_p5 = scmp.ne.s32.totalorder %s1221_s12, %s1222_s2  ;;  %s1227_s23 = scalar_lea.hbm %s1782_s0, 256 }
  0x22   : > { %p1228_p10 = scmp.lt.s32.totalorder %s1221_s12, %s1782_s0  ;;  %p1229_p1 = scmp.lt.s32.totalorder %s1227_s23, %s1222_s2 }
  0x23   : > { %p1225_p8 = pnand %p1224_p7, %p1223_p5 }
  0x24   : > { %p1230_p0 = por %p1229_p1, %p1228_p10 }
  0x25   : > { %p1226_p9 = pneg %p1225_p8 }
  0x27   : > { %p1231_p2 = pnand %p1230_p0, %p1226_p9 }
  0x29   : > { %1234 = shalt.err (!%p1231_p2)
}
  0x2a   : > { %s1324_s25 = smov 1024   ;;  %s1325_s26 = smov 256  }
  0x2b   : > { %s1326_s11 = smov 16   ;;  %230 = sbr.rel (%p1421_p13) target bundleno = 445 (0x1bd), region = 40 }
  0x2c   : > { %1090 = dma.hbm_to_vmem [thread:$0]  (!%p1438_p3), %s217_s10, 1024, %s219_s1, %s207_s28, %s1324_s25, %s1325_s26, %s1326_s11  }
  0x2d   : > { %s1460_s13 = sand.u32 (!%p1421_p13), 1, %s1312_s19  }
  0x2e   : > { %s1050_s14 = sshll.u32 (!%p1421_p13), %s1460_s13, 6  ;;  %s233_s2 = scalar_lea.sflag (!%p1421_p13), [#allocation3], %s1460_s13 }
  0x2f   : > { %s1464_s12 = scalar_lea.vmem (!%p1421_p13), [#allocation2], %s1050_s14 }
  0x30   : > { %1295 = dma.done.wait (%p1406_p6), %s233_s2, 1024  }
  0x31   : > { %1297 = vsyncadd (%p1406_p6), %s233_s2, 4294966272 }
  0x32   : > { %1299 = dma.done.wait (%p43_p4), [#allocation6], 128  }
  0x33   : > { %1301 = vsyncadd (%p43_p4), [#allocation6], 4294967168  ;;  %v345_v0 = vlaneseq  ;;  %v317_v3 = vld [vmem:[#allocation7] sm:$0x7]  ;;  %v316_v4 = vld [vmem:[#allocation5] sm:$0x7] }
  0x34   : > { %v541_v5 = vperm.slane %v317_v3, 2  ;;  %v394_v6 = vperm.slane %v316_v4, 2  ;;  %v369_v9 = vperm.slane %v316_v4, 1  ;;  %v516_v10 = vperm.slane %v317_v3, 1  ;;  %v282_v12 = vld [vmem:[%s1464_s12 + $0x10] sm:$0x33] }
  0x35   : > { %v1474_v1 = vshrl.u32 %v345_v0, 7  ;;  %v1486_v11 = vperm.slane %v316_v4, 0  ;;  %v283_v13 = vld [vmem:[%s1464_s12 + $0x18] sm:$0x33]  ;;  %v294_v14 = vld [vmem:[%s1464_s12 + $0x30] sm:$0xff]  ;;  %v288_v16 = vld [vmem:[%s1464_s12 + $0x20] sm:$0xff]  ;;  %v285_v18 = vunpack.c.h.bf16 %v282_v12  ;;  %v1499_v28 = vunpack.c.l.bf16 %v282_v12 }
  0x36   : > { %v295_v15 = vld [vmem:[%s1464_s12 + $0x38] sm:$0xff]  ;;  %v1495_v17 = vperm.slane %v317_v3, 0  ;;  %v297_v19 = vunpack.c.h.bf16 %v294_v14  ;;  %v289_v21 = vld [vmem:[%s1464_s12 + $0x28] sm:$0xff]  ;;  %v286_v22 = vunpack.c.l.bf16 %v283_v13  ;;  %v296_v23 = vunpack.c.l.bf16 %v294_v14  ;;  %s1067_s23 = smul.u32 48, %s1460_s13  ;;  %s1066_s8 = sshll.u32 %s1382_s22, 4 }
  0x37   : > { %v365_v2 = vadd.s32 24, %v1474_v1  ;;  %1144 = vset.pattern.permute.xlu2 %v1474_v1  ;;  %v1479_v7 = vadd.s32 8, %v1474_v1  ;;  %v359_v8 = vadd.s32 16, %v1474_v1  ;;  %v298_v20 = vunpack.c.l.bf16 %v295_v15  ;;  %s945_s11 = scalar_lea.hbm %s1787_s5, %s1066_s8  ;;  %s934_s2 = scalar_lea.sflag [#allocation4], %s1460_s13 }
  0x38   : > { %v287_v24 = vunpack.c.h.bf16 %v283_v13  ;;  %785 = vmatpush.msra.mxu1 %v297_v19  ;;  %v299_v25 = vunpack.c.h.bf16 %v295_v15  ;;  %v290_v26 = vunpack.c.l.bf16 %v288_v16  ;;  %v291_v27 = vunpack.c.h.bf16 %v288_v16  ;;  %762 = vmatpush.msra.mxu0 %v296_v23  ;;  %s1733_s9 = scalar_lea.vmem [#allocation8], %s1067_s23  ;;  %s948_s22 = sshll.u32 %s945_s11, 4  ;;  %s949_s22 = int_to_ptr.hbm [resolvable:$true] %s948_s22 }
  0x39   : > { %1145 = vset.pattern.permute.xlu1 %v365_v2  ;;  %1142 = vset.pattern.permute.xlu0 %v365_v2  ;;  %v292_v29 = vunpack.c.l.bf16 %v289_v21  ;;  %v1502_v30 = vrot.slane %v285_v18, 7  ;;  %v305_v31 = vsub.f32 1.0, %v297_v19  ;;  %v306_v32 = vsub.f32 1.0, %v298_v20  ;;  %s946_s14 = sshll.u32 %s1733_s9, 4  ;;  %s1270_s16 = scalar_lea.hbm %s1787_s5, 192  ;;  %s947_s14 = int_to_ptr.vmem [resolvable:$true] %s946_s14 }
  0x3a   : > { %808 = vmatpush.msra.mxu2 %v298_v20  ;;  %831 = vmatpush.msra.mxu3 %v299_v25  ;;  %v293_v33 = vunpack.c.h.bf16 %v289_v21  ;;  %v1504_v34 = vrot.slane %v286_v22, 6  ;;  %v300_v35 = vsub.f32 1.0, %v290_v26  ;;  %v304_v36 = vsub.f32 1.0, %v296_v23 }
  0x3b   : > { %v307_v37 = vsub.f32 1.0, %v299_v25  ;;  %v1506_v38 = vrot.slane %v287_v24, 5  ;;  %v301_v39 = vsub.f32 1.0, %v291_v27  ;;  %v302_v40 = vsub.f32 1.0, %v292_v29 }
  0x3c   : > { %v303_v41 = vsub.f32 1.0, %v293_v33  ;;  %v312_v42 = vmul.f32 %v304_v36, %v290_v26  ;;  %v313_v43 = vmul.f32 %v305_v31, %v291_v27  ;;  %v314_v44 = vmul.f32 %v306_v32, %v292_v29 }
  0x3d   : > { %v315_v45 = vmul.f32 %v307_v37, %v293_v33  ;;  %vm327_vm0 = vcmask 1042434   ;;  %v309_v46 = vmul.f32 %v305_v31, %v301_v39  ;;  %vm325_vm1 = vcmask 1040384  }
  0x3e   : > { %v310_v47 = vmul.f32 %v306_v32, %v302_v40  ;;  %v1508_v48 = vmul.f32 %v304_v36, %v300_v35  ;;  %763 = vmatpush.msra.mxu0 %v312_v42  ;;  %786 = vmatpush.msra.mxu1 %v313_v43  ;;  %v326_v49 = vsel %vm325_vm1, %v1499_v28, %v1502_v30  ;;  %vm329_vm2 = vcmask 1041408  }
  0x3f   : > { %399 = vperm.xlu2 %1144, %v394_v6   ;;  %v311_v50 = vmul.f32 %v307_v37, %v303_v41  ;;  %809 = vmatpush.msra.mxu2 %v314_v44  ;;  %v1514_v51 = vrot.slane %v309_v46, 7  ;;  %v328_v52 = vsel %vm327_vm0, %v1504_v34, %v1506_v38  ;;  %vm339_vm3 = vcmask 1044484  }
  0x40   : > { %832 = vmatpush.msra.mxu3 %v315_v45  ;;  %764 = vmatpush.msra.mxu0 %v1508_v48  ;;  %v1521_v53 = vsel %vm329_vm2, %v326_v49, %v328_v52  ;;  %v667_v55 = vrot.slane %v310_v47, 6  ;;  %vm341_vm4 = vcmask 1043458   ;;  %v338_v59 = vsel %vm327_vm0, %v1499_v28, %v1502_v30 }
  0x41   : > { %564 = vperm.xlu1 %1145, %v541_v5   ;;  %417 = vperm.xlu0 %1142, %v394_v6   ;;  %v669_v54 = vsel %vm325_vm1, %v1508_v48, %v1514_v51  ;;  %v668_v56 = vrot.slane %v311_v50, 5  ;;  %v340_v60 = vsel %vm339_vm3, %v1504_v34, %v1506_v38  ;;  %v676_v62 = vsel %vm327_vm0, %v1508_v48, %v1514_v51 }
  0x42   : > { %787 = vmatpush.msra.mxu1 %v309_v46  ;;  %810 = vmatpush.msra.mxu2 %v310_v47  ;;  %v342_v61 = vsel %vm341_vm4, %v338_v59, %v340_v60  ;;  %vm331_vm5 = vcmask 1041409   ;;  %vm333_vm6 = vcmask 1043459   ;;  %vm335_vm7 = vcmask 1042433  }
  0x43   : > { %v670_v57 = vsel %vm327_vm0, %v667_v55, %v668_v56  ;;  %833 = vmatpush.msra.mxu3 %v311_v50  ;;  %v677_v63 = vsel %vm339_vm3, %v667_v55, %v668_v56  ;;  %v343_v0 = vrot.slane %v342_v61, 2  ;;  %v332_v27 = vsel %vm331_vm5, %v1499_v28, %v1502_v30 }
  0x44   : > { %v1529_v58 = vsel %vm329_vm2, %v669_v54, %v670_v57  ;;  %v334_v29 = vsel %vm333_vm6, %v1504_v34, %v1506_v38  ;;  %v672_v34 = vsel %vm331_vm5, %v1508_v48, %v1514_v51  ;;  %v673_v37 = vsel %vm333_vm6, %v667_v55, %v668_v56 }
  0x45   : > { %v1545_v3 = vperm.slane %v343_v0, 1  ;;  %v1547_v4 = vperm.slane %v343_v0, 2  ;;  %v336_v36 = vsel %vm335_vm7, %v332_v27, %v334_v29  ;;  %v674_v45 = vsel %vm335_vm7, %v672_v34, %v673_v37 }
  0x46   : > { %v337_v28 = vrot.slane %v336_v36, 1  ;;  %vm754_vm8 = vcmask 982016   ;;  %vm864_vm9 = vcmask 1043456  }
  0x47   : > { %1147 = vset.pattern.permute.xlu2 %v359_v8 }
  0x48   : > { %v1580_v40 = vperm.slane %v337_v28, 0  ;;  %v1587_v50 = vperm.slane %v337_v28, 1  ;;  %v1589_v51 = vperm.slane %v337_v28, 2  ;;  %v1591_v52 = vperm.slane %v337_v28, 3 }
  0x49   : > { %1146 = vset.pattern.permute.xlu1 %v1479_v7  ;;  %1143 = vset.pattern.permute.xlu0 %v359_v8 }
  0x4f   : > { %558 = vperm.xlu2 %1147, %v541_v5  }
  0x51   : > { %405 = vperm.xlu1 %1146, %v394_v6   ;;  %411 = vperm.xlu0 %1143, %v394_v6  }
  0x57   : > { %1148 = vset.pattern.permute.xlu2 %v365_v2 }
  0x59   : > { %552 = vperm.xlu1 %1146, %v541_v5   ;;  %1149 = vset.pattern.permute.xlu0 %v1474_v1 }
  0x5f   : > { %392 = vperm.xlu2 %1148, %v369_v9  }
  0x61   : > { %1150 = vset.pattern.permute.xlu1 %v359_v8  ;;  %546 = vperm.xlu0 %1149, %v541_v5   ;;  %v1549_v5 = vperm.slane %v343_v0, 3 }
  0x67   : > { %539 = vperm.xlu2 %1148, %v516_v10  }
  0x69   : > { %386 = vperm.xlu1 %1150, %v369_v9   ;;  %374 = vperm.xlu0 %1149, %v369_v9  }
  0x6f   : > { %1152 = vset.pattern.permute.xlu2 %v359_v8 }
  0x71   : > { %1151 = vset.pattern.permute.xlu1 %v1479_v7  ;;  %521 = vperm.xlu0 %1149, %v516_v10  }
  0x77   : > { %533 = vperm.xlu2 %1152, %v516_v10  }
  0x79   : > { %380 = vperm.xlu1 %1151, %v369_v9   ;;  %1155 = vset.pattern.permute.xlu0 %v1479_v7 }
  0x7f   : > { %1153 = vset.pattern.permute.xlu2 %v365_v2  ;;  %v1543_v2 = vperm.slane %v343_v0, 0 }
  0x81   : > { %527 = vperm.xlu1 %1151, %v516_v10   ;;  %355 = vperm.xlu0 %1155, %v1486_v11  }
  0x87   : > { %367 = vperm.xlu2 %1153, %v1486_v11  }
  0x89   : > { %1154 = vset.pattern.permute.xlu1 %v359_v8 }
  0x8f   : > { %514 = vperm.xlu2 %1153, %v1495_v17  }
  0x91   : > { %361 = vperm.xlu1 %1154, %v1486_v11  }
  0x97   : > { %1156 = vset.pattern.permute.xlu2 %v1474_v1  ;;  %v678_v1 = vsel %vm341_vm4, %v676_v62, %v677_v63 }
  0x99   : > { %508 = vperm.xlu1 %1154, %v1495_v17   ;;  %v1551_v6 = vpop.permute.xlu2 %399 }
  0x9a   : > { %v476_v34 = vmul.f32 %v1545_v3, %v1551_v6  ;;  %v477_v37 = vmul.f32 %v1547_v4, %v1551_v6 }
  0x9f   : > { %349 = vperm.xlu2 %1156, %v1486_v11  }
  0xa1   : > { %1157 = vset.pattern.permute.xlu1 %v1479_v7  ;;  %v679_v7 = vrot.slane %v678_v1, 2 }
  0xa3   : > { %v1557_v14 = vperm.slane %v679_v7, 0  ;;  %v1559_v15 = vperm.slane %v679_v7, 1  ;;  %v1561_v16 = vperm.slane %v679_v7, 2 }
  0xa7   : > { %496 = vperm.xlu2 %1156, %v1495_v17  }
  0xa9   : > { %502 = vperm.xlu1 %1157, %v1495_v17   ;;  %v1563_v17 = vperm.slane %v679_v7, 3  ;;  %v559_v26 = vpop.permute.xlu2 %558 }
  0xb3   : > { %v418_v8 = vpop.permute.xlu0 %417  ;;  %v565_v13 = vpop.permute.xlu1 %564 }
  0xb4   : > { %v487_v9 = vmul.f32 %v1543_v2, %v418_v8  ;;  %v488_v10 = vmul.f32 %v1545_v3, %v418_v8  ;;  %v489_v11 = vmul.f32 %v1547_v4, %v418_v8  ;;  %v490_v12 = vmul.f32 %v1549_v5, %v418_v8 }
  0xb6   : > { %v610_v18 = vadd.f32 %v565_v13, %v487_v9  ;;  %v611_v19 = vadd.f32 %v565_v13, %v488_v10  ;;  %v612_v20 = vadd.f32 %v565_v13, %v489_v11  ;;  %v613_v21 = vadd.f32 %v565_v13, %v490_v12 }
  0xb8   : > { %v658_v22 = vmax.f32 %v610_v18, 0.0  ;;  %v659_v23 = vmax.f32 %v611_v19, 0.0  ;;  %v660_v24 = vmax.f32 %v612_v20, 0.0  ;;  %v661_v25 = vmax.f32 %v613_v21, 0.0 }
  0xb9   : > { %v393_v30 = vpop.permute.xlu2 %392 }
  0xba   : > { %v748_v31 = vmul.f32 %v1557_v14, %v658_v22  ;;  %v749_v32 = vmul.f32 %v1559_v15, %v659_v23  ;;  %v750_v33 = vmul.f32 %v1561_v16, %v660_v24  ;;  %v751_v35 = vmul.f32 %v1563_v17, %v661_v25 }
  0xbb   : > { %v471_v54 = vmul.f32 %v1580_v40, %v393_v30  ;;  %v472_v19 = vmul.f32 %v1587_v50, %v393_v30  ;;  %v473_v20 = vmul.f32 %v1589_v51, %v393_v30  ;;  %v474_v21 = vmul.f32 %v1591_v52, %v393_v30 }
  0xbc   : > { %765 = vmatpush.msra.mxu0 %v748_v31  ;;  %788 = vmatpush.msra.mxu1 %v749_v32 }
  0xbd   : > { %811 = vmatpush.msra.mxu2 %v750_v33  ;;  %834 = vmatpush.msra.mxu3 %v751_v35  ;;  %v475_v35 = vmul.f32 %v1543_v2, %v1551_v6 }
  0xc1   : > { %v540_v18 = vpop.permute.xlu2 %539 }
  0xc2   : > { %v594_v27 = vadd.f32 %v540_v18, %v471_v54  ;;  %v595_v36 = vadd.f32 %v540_v18, %v472_v19  ;;  %v596_v28 = vadd.f32 %v540_v18, %v473_v20  ;;  %v597_v30 = vadd.f32 %v540_v18, %v474_v21 }
  0xc3   : > { %v406_v38 = vpop.permute.xlu1 %405  ;;  %v412_v39 = vpop.permute.xlu0 %411 }
  0xc4   : > { %v483_v41 = vmul.f32 %v1543_v2, %v412_v39  ;;  %v484_v42 = vmul.f32 %v1545_v3, %v412_v39  ;;  %v485_v43 = vmul.f32 %v1547_v4, %v412_v39  ;;  %v486_v44 = vmul.f32 %v1549_v5, %v412_v39 }
  0xc5   : > { %v479_v60 = vmul.f32 %v1543_v2, %v406_v38  ;;  %v480_v61 = vmul.f32 %v1545_v3, %v406_v38  ;;  %v481_v62 = vmul.f32 %v1547_v4, %v406_v38  ;;  %v482_v63 = vmul.f32 %v1549_v5, %v406_v38 }
  0xc6   : > { %v606_v46 = vadd.f32 %v559_v26, %v483_v41  ;;  %v607_v47 = vadd.f32 %v559_v26, %v484_v42  ;;  %v608_v49 = vadd.f32 %v559_v26, %v485_v43  ;;  %v609_v48 = vadd.f32 %v559_v26, %v486_v44 }
  0xc7   : > { %v675_v26 = vrot.slane %v674_v45, 1  ;;  %v478_v38 = vmul.f32 %v1549_v5, %v1551_v6  ;;  %v642_v41 = vmax.f32 %v594_v27, 0.0  ;;  %v643_v4 = vmax.f32 %v595_v36, 0.0 }
  0xc8   : > { %v654_v55 = vmax.f32 %v606_v46, 0.0  ;;  %v655_v56 = vmax.f32 %v607_v47, 0.0  ;;  %v656_v57 = vmax.f32 %v608_v49, 0.0  ;;  %v657_v59 = vmax.f32 %v609_v48, 0.0 }
  0xc9   : > { %v1617_v42 = vperm.slane %v675_v26, 0  ;;  %v1619_v2 = vperm.slane %v675_v26, 1  ;;  %v1621_v43 = vperm.slane %v675_v26, 2  ;;  %v644_v47 = vmax.f32 %v596_v28, 0.0 }
  0xca   : > { %v744_v1 = vmul.f32 %v1557_v14, %v654_v55  ;;  %v745_v7 = vmul.f32 %v1559_v15, %v655_v56  ;;  %v746_v8 = vmul.f32 %v1561_v16, %v656_v57  ;;  %v747_v9 = vmul.f32 %v1563_v17, %v657_v59 }
  0xcb   : > { %v553_v0 = vpop.permute.xlu1 %552  ;;  %v645_v49 = vmax.f32 %v597_v30, 0.0  ;;  %v1623_v5 = vperm.slane %v675_v26, 3  ;;  %v732_v56 = vmul.f32 %v1617_v42, %v642_v41 }
  0xcc   : > { %v602_v10 = vadd.f32 %v553_v0, %v479_v60  ;;  %v603_v11 = vadd.f32 %v553_v0, %v480_v61  ;;  %v604_v12 = vadd.f32 %v553_v0, %v481_v62  ;;  %v605_v13 = vadd.f32 %v553_v0, %v482_v63  ;;  %766 = vmatpush.msra.mxu0 %v744_v1 }
  0xcd   : > { %789 = vmatpush.msra.mxu1 %v745_v7  ;;  %812 = vmatpush.msra.mxu2 %v746_v8  ;;  %v733_v62 = vmul.f32 %v1619_v2, %v643_v4  ;;  %v734_v63 = vmul.f32 %v1621_v43, %v644_v47  ;;  %v735_v1 = vmul.f32 %v1623_v5, %v645_v49  ;;  %v1669_v4 = vperm.slane %v1529_v58, 3 }
  0xce   : > { %835 = vmatpush.msra.mxu3 %v747_v9  ;;  %v650_v22 = vmax.f32 %v602_v10, 0.0  ;;  %v651_v23 = vmax.f32 %v603_v11, 0.0  ;;  %v652_v24 = vmax.f32 %v604_v12, 0.0  ;;  %v653_v25 = vmax.f32 %v605_v13, 0.0 }
  0xd0   : > { %v740_v29 = vmul.f32 %v1557_v14, %v650_v22  ;;  %v741_v31 = vmul.f32 %v1559_v15, %v651_v23  ;;  %v742_v32 = vmul.f32 %v1561_v16, %v652_v24  ;;  %v743_v33 = vmul.f32 %v1563_v17, %v653_v25 }
  0xd1   : > { %v534_v0 = vpop.permute.xlu2 %533  ;;  %v1638_v22 = vperm.slane %v1521_v53, 0  ;;  %v1641_v23 = vperm.slane %v1521_v53, 1  ;;  %v1644_v24 = vperm.slane %v1521_v53, 2  ;;  %v1647_v25 = vperm.slane %v1521_v53, 3 }
  0xd2   : > { %767 = vmatpush.msra.mxu0 %v740_v29  ;;  %790 = vmatpush.msra.mxu1 %v741_v31 }
  0xd3   : > { %813 = vmatpush.msra.mxu2 %v742_v32  ;;  %836 = vmatpush.msra.mxu3 %v743_v33  ;;  %v547_v39 = vpop.permute.xlu0 %546 }
  0xd4   : > { %v598_v44 = vadd.f32 %v547_v39, %v475_v35  ;;  %v599_v3 = vadd.f32 %v547_v39, %v476_v34  ;;  %v600_v45 = vadd.f32 %v547_v39, %v477_v37  ;;  %v601_v46 = vadd.f32 %v547_v39, %v478_v38 }
  0xd6   : > { %v646_v6 = vmax.f32 %v598_v44, 0.0  ;;  %v647_v48 = vmax.f32 %v599_v3, 0.0  ;;  %v648_v54 = vmax.f32 %v600_v45, 0.0  ;;  %v649_v55 = vmax.f32 %v601_v46, 0.0 }
  0xd7   : > { %v1660_v3 = vperm.slane %v1529_v58, 0  ;;  %v1663_v45 = vperm.slane %v1529_v58, 1  ;;  %v1666_v46 = vperm.slane %v1529_v58, 2 }
  0xd8   : > { %v736_v57 = vmul.f32 %v1557_v14, %v646_v6  ;;  %v737_v59 = vmul.f32 %v1559_v15, %v647_v48  ;;  %v738_v60 = vmul.f32 %v1561_v16, %v648_v54  ;;  %v739_v61 = vmul.f32 %v1563_v17, %v649_v55 }
  0xda   : > { %768 = vmatpush.msra.mxu0 %v736_v57  ;;  %791 = vmatpush.msra.mxu1 %v737_v59 }
  0xdb   : > { %814 = vmatpush.msra.mxu2 %v738_v60  ;;  %837 = vmatpush.msra.mxu3 %v739_v61  ;;  %v387_v7 = vpop.permute.xlu1 %386  ;;  %v375_v20 = vpop.permute.xlu0 %374 }
  0xdc   : > { %v467_v14 = vmul.f32 %v1580_v40, %v387_v7  ;;  %v468_v15 = vmul.f32 %v1587_v50, %v387_v7  ;;  %v469_v16 = vmul.f32 %v1589_v51, %v387_v7  ;;  %v470_v17 = vmul.f32 %v1591_v52, %v387_v7  ;;  %769 = vmatpush.msra.mxu0 %v732_v56 }
  0xdd   : > { %792 = vmatpush.msra.mxu1 %v733_v62  ;;  %815 = vmatpush.msra.mxu2 %v734_v63  ;;  %v459_v36 = vmul.f32 %v1580_v40, %v375_v20  ;;  %v460_v28 = vmul.f32 %v1587_v50, %v375_v20  ;;  %v461_v47 = vmul.f32 %v1589_v51, %v375_v20 }
  0xde   : > { %838 = vmatpush.msra.mxu3 %v735_v1  ;;  %v590_v8 = vadd.f32 %v534_v0, %v467_v14  ;;  %v591_v9 = vadd.f32 %v534_v0, %v468_v15  ;;  %v592_v10 = vadd.f32 %v534_v0, %v469_v16  ;;  %v593_v11 = vadd.f32 %v534_v0, %v470_v17 }
  0xdf   : > { %v462_v49 = vmul.f32 %v1591_v52, %v375_v20 }
  0xe0   : > { %v638_v12 = vmax.f32 %v590_v8, 0.0  ;;  %v639_v13 = vmax.f32 %v591_v9, 0.0  ;;  %v640_v18 = vmax.f32 %v592_v10, 0.0  ;;  %v641_v19 = vmax.f32 %v593_v11, 0.0 }
  0xe1   : > { %v368_v21 = vpop.permute.xlu2 %367 }
  0xe2   : > { %v728_v26 = vmul.f32 %v1617_v42, %v638_v12  ;;  %v729_v27 = vmul.f32 %v1619_v2, %v639_v13  ;;  %v730_v29 = vmul.f32 %v1621_v43, %v640_v18  ;;  %v731_v31 = vmul.f32 %v1623_v5, %v641_v19 }
  0xe3   : > { %v455_v32 = vmul.f32 %v1638_v22, %v368_v21  ;;  %v456_v33 = vmul.f32 %v1641_v23, %v368_v21  ;;  %v457_v35 = vmul.f32 %v1644_v24, %v368_v21  ;;  %v458_v53 = vmul.f32 %v1647_v25, %v368_v21  ;;  %v522_v44 = vpop.permute.xlu0 %521 }
  0xe4   : > { %770 = vmatpush.msra.mxu0 %v728_v26  ;;  %793 = vmatpush.msra.mxu1 %v729_v27  ;;  %v582_v56 = vadd.f32 %v522_v44, %v459_v36  ;;  %v583_v57 = vadd.f32 %v522_v44, %v460_v28  ;;  %v584_v58 = vadd.f32 %v522_v44, %v461_v47 }
  0xe5   : > { %816 = vmatpush.msra.mxu2 %v730_v29  ;;  %839 = vmatpush.msra.mxu3 %v731_v31  ;;  %v585_v63 = vadd.f32 %v522_v44, %v462_v49 }
  0xe6   : > { %v630_v16 = vmax.f32 %v582_v56, 0.0  ;;  %v631_v17 = vmax.f32 %v583_v57, 0.0  ;;  %v632_v12 = vmax.f32 %v584_v58, 0.0 }
  0xe7   : > { %v633_v13 = vmax.f32 %v585_v63, 0.0 }
  0xe8   : > { %v722_v29 = vmul.f32 %v1621_v43, %v632_v12 }
  0xe9   : > { %v515_v30 = vpop.permute.xlu2 %514  ;;  %v723_v31 = vmul.f32 %v1623_v5, %v633_v13 }
  0xea   : > { %v578_v34 = vadd.f32 %v515_v30, %v455_v32  ;;  %v579_v37 = vadd.f32 %v515_v30, %v456_v33  ;;  %v580_v38 = vadd.f32 %v515_v30, %v457_v35  ;;  %v581_v39 = vadd.f32 %v515_v30, %v458_v53 }
  0xeb   : > { %v381_v41 = vpop.permute.xlu1 %380 }
  0xec   : > { %v626_v6 = vmax.f32 %v578_v34, 0.0  ;;  %v627_v48 = vmax.f32 %v579_v37, 0.0  ;;  %v628_v54 = vmax.f32 %v580_v38, 0.0  ;;  %v629_v55 = vmax.f32 %v581_v39, 0.0 }
  0xed   : > { %v463_v0 = vmul.f32 %v1580_v40, %v381_v41  ;;  %v464_v1 = vmul.f32 %v1587_v50, %v381_v41  ;;  %v465_v7 = vmul.f32 %v1589_v51, %v381_v41  ;;  %v466_v14 = vmul.f32 %v1591_v52, %v381_v41 }
  0xee   : > { %v716_v59 = vmul.f32 %v1660_v3, %v626_v6  ;;  %v717_v60 = vmul.f32 %v1663_v45, %v627_v48  ;;  %v718_v61 = vmul.f32 %v1666_v46, %v628_v54  ;;  %v719_v62 = vmul.f32 %v1669_v4, %v629_v55 }
  0xef   : > { %v720_v40 = vmul.f32 %v1617_v42, %v630_v16  ;;  %v721_v50 = vmul.f32 %v1619_v2, %v631_v17  ;;  %v1327_v17 = vmov 0  }
  0xf0   : > { %1158 = vset.pattern.permute.xlu0 %v1327_v17  ;;  %1159 = vset.pattern.permute.xlu1 %v1327_v17 }
  0xf3   : > { %v528_v15 = vpop.permute.xlu1 %527 }
  0xf4   : > { %v586_v8 = vadd.f32 %v528_v15, %v463_v0  ;;  %v587_v9 = vadd.f32 %v528_v15, %v464_v1  ;;  %v588_v10 = vadd.f32 %v528_v15, %v465_v7  ;;  %v589_v11 = vadd.f32 %v528_v15, %v466_v14  ;;  %v853_v1 = vld [vmem:[%s1786_s4] sm:$0xff] }
  0xf5   : > { %857 = vperm.xlu0 %1158, %v853_v1  }
  0xf6   : > { %v634_v18 = vmax.f32 %v586_v8, 0.0  ;;  %v635_v19 = vmax.f32 %v587_v9, 0.0  ;;  %v636_v20 = vmax.f32 %v588_v10, 0.0  ;;  %v637_v21 = vmax.f32 %v589_v11, 0.0  ;;  %v854_v8 = vld [vmem:[%s1786_s4 + $0x8] sm:$0xf]  ;;  %v356_v9 = vpop.permute.xlu0 %355 }
  0xf7   : > { %862 = vperm.xlu1 %1159, %v854_v8   ;;  %v447_v10 = vmul.f32 %v1638_v22, %v356_v9  ;;  %v448_v11 = vmul.f32 %v1641_v23, %v356_v9  ;;  %v449_v12 = vmul.f32 %v1644_v24, %v356_v9  ;;  %v450_v13 = vmul.f32 %v1647_v25, %v356_v9 }
  0xf8   : > { %v724_v51 = vmul.f32 %v1617_v42, %v634_v18  ;;  %v725_v52 = vmul.f32 %v1619_v2, %v635_v19  ;;  %v726_v26 = vmul.f32 %v1621_v43, %v636_v20  ;;  %v727_v27 = vmul.f32 %v1623_v5, %v637_v21 }
  0xf9   : > { %v350_v32 = vpop.permute.xlu2 %349 }
  0xfa   : > { %771 = vmatpush.msra.mxu0 %v724_v51  ;;  %794 = vmatpush.msra.mxu1 %v725_v52  ;;  %v443_v42 = vmul.f32 %v1638_v22, %v350_v32  ;;  %v444_v2 = vmul.f32 %v1641_v23, %v350_v32  ;;  %v445_v33 = vmul.f32 %v1644_v24, %v350_v32 }
  0xfb   : > { %817 = vmatpush.msra.mxu2 %v726_v26  ;;  %840 = vmatpush.msra.mxu3 %v727_v27  ;;  %v446_v43 = vmul.f32 %v1647_v25, %v350_v32 }
  0xfc   : > { %772 = vmatpush.msra.mxu0 %v720_v40  ;;  %795 = vmatpush.msra.mxu1 %v721_v50 }
  0xfd   : > { %818 = vmatpush.msra.mxu2 %v722_v29  ;;  %841 = vmatpush.msra.mxu3 %v723_v31 }
  0xfe   : > { %773 = vmatpush.msra.mxu0 %v716_v59  ;;  %796 = vmatpush.msra.mxu1 %v717_v60 }
  0xff   : > { %819 = vmatpush.msra.mxu2 %v718_v61  ;;  %842 = vmatpush.msra.mxu3 %v719_v62 }
 0x101   : > { %v497_v5 = vpop.permute.xlu2 %496 }
 0x102   : > { %v566_v35 = vadd.f32 %v497_v5, %v443_v42  ;;  %v567_v53 = vadd.f32 %v497_v5, %v444_v2  ;;  %v568_v36 = vadd.f32 %v497_v5, %v445_v33  ;;  %v569_v28 = vadd.f32 %v497_v5, %v446_v43 }
 0x103   : > { %v362_v30 = vpop.permute.xlu1 %361 }
 0x104   : > { %v614_v34 = vmax.f32 %v566_v35, 0.0  ;;  %v615_v37 = vmax.f32 %v567_v53, 0.0  ;;  %v616_v38 = vmax.f32 %v568_v36, 0.0  ;;  %v617_v39 = vmax.f32 %v569_v28, 0.0 }
 0x105   : > { %v451_v6 = vmul.f32 %v1638_v22, %v362_v30  ;;  %v452_v48 = vmul.f32 %v1641_v23, %v362_v30  ;;  %v453_v54 = vmul.f32 %v1644_v24, %v362_v30  ;;  %v454_v55 = vmul.f32 %v1647_v25, %v362_v30  ;;  %v752_v24 = vld [vmem:[%s1785_s3] sm:$0xff]  ;;  %v753_v25 = vld [vmem:[%s1785_s3 + $0x8] sm:$0xf] }
 0x106   : > { %v704_v41 = vmul.f32 %v1660_v3, %v614_v34  ;;  %v705_v44 = vmul.f32 %v1663_v45, %v615_v37  ;;  %v706_v47 = vmul.f32 %v1666_v46, %v616_v38  ;;  %v707_v49 = vmul.f32 %v1669_v4, %v617_v39 }
 0x10b   : > { %v509_v56 = vpop.permute.xlu1 %508 }
 0x10c   : > { %v574_v57 = vadd.f32 %v509_v56, %v451_v6  ;;  %v575_v59 = vadd.f32 %v509_v56, %v452_v48  ;;  %v576_v60 = vadd.f32 %v509_v56, %v453_v54  ;;  %v577_v61 = vadd.f32 %v509_v56, %v454_v55 }
 0x10e   : > { %v622_v62 = vmax.f32 %v574_v57, 0.0  ;;  %v623_v58 = vmax.f32 %v575_v59, 0.0  ;;  %v624_v63 = vmax.f32 %v576_v60, 0.0  ;;  %v625_v0 = vmax.f32 %v577_v61, 0.0 }
 0x110   : > { %v712_v7 = vmul.f32 %v1660_v3, %v622_v62  ;;  %v713_v14 = vmul.f32 %v1663_v45, %v623_v58  ;;  %v714_v15 = vmul.f32 %v1666_v46, %v624_v63  ;;  %v715_v16 = vmul.f32 %v1669_v4, %v625_v0 }
 0x112   : > { %774 = vmatpush.msra.mxu0 %v712_v7  ;;  %797 = vmatpush.msra.mxu1 %v713_v14 }
 0x113   : > { %820 = vmatpush.msra.mxu2 %v714_v15  ;;  %843 = vmatpush.msra.mxu3 %v715_v16 }
 0x11b   : > { %v503_v18 = vpop.permute.xlu1 %502 }
 0x11c   : > { %v570_v19 = vadd.f32 %v503_v18, %v447_v10  ;;  %v571_v20 = vadd.f32 %v503_v18, %v448_v11  ;;  %v572_v21 = vadd.f32 %v503_v18, %v449_v12  ;;  %v573_v40 = vadd.f32 %v503_v18, %v450_v13 }
 0x11e   : > { %v618_v50 = vmax.f32 %v570_v19, 0.0  ;;  %v619_v51 = vmax.f32 %v571_v20, 0.0  ;;  %v620_v52 = vmax.f32 %v572_v21, 0.0  ;;  %v621_v26 = vmax.f32 %v573_v40, 0.0 }
 0x120   : > { %v708_v27 = vmul.f32 %v1660_v3, %v618_v50  ;;  %v709_v29 = vmul.f32 %v1663_v45, %v619_v51  ;;  %v710_v22 = vmul.f32 %v1666_v46, %v620_v52  ;;  %v711_v23 = vmul.f32 %v1669_v4, %v621_v26  ;;  %v276_v45 = vld [vmem:[%s1464_s12] sm:$0xff]  ;;  %v277_v46 = vld [vmem:[%s1464_s12 + $0x8] sm:$0xff]  ;;  %s1264_s12 = sshra.s32 %s949_s22, 4  ;;  %s1265_s12 = int_to_ptr.hbm [resolvable:$true] %s1264_s12 }
 0x121   : > { %v278_v32 = vunpack.c.l.bf16 %v276_v45  ;;  %v279_v42 = vunpack.c.h.bf16 %v276_v45  ;;  %v280_v2 = vunpack.c.l.bf16 %v277_v46  ;;  %v281_v33 = vunpack.c.h.bf16 %v277_v46  ;;  %s1266_s1 = scalar_lea.hbm %s1265_s12, 48  ;;  %p1271_p3 = scmp.lt.s32.totalorder %s1265_s12, %s1787_s5 }
 0x122   : > { %775 = vmatpush.msra.mxu0 %v708_v27  ;;  %798 = vmatpush.msra.mxu1 %v709_v29  ;;  %p1267_p4 = scmp.ne.s32.totalorder %s1265_s12, %s1266_s1  ;;  %p1272_p5 = scmp.lt.s32.totalorder %s1270_s16, %s1266_s1 }
 0x123   : > { %821 = vmatpush.msra.mxu2 %v710_v22  ;;  %844 = vmatpush.msra.mxu3 %v711_v23 }
 0x124   : > { %776 = vmatpush.msra.mxu0 %v704_v41  ;;  %799 = vmatpush.msra.mxu1 %v705_v44  ;;  %p1268_p6 = pnand %p1267_p4, %p1413_p11  ;;  %p1273_p7 = por %p1272_p5, %p1271_p3 }
 0x125   : > { %822 = vmatpush.msra.mxu2 %v706_v47  ;;  %845 = vmatpush.msra.mxu3 %v707_v49 }
 0x126   : > { %1053 = vmatmul.msk.f32.vlgmr.msra.gmra.mxu0 %vm754_vm8, %v752_v24  ;;  %1055 = vmatmul.msk.f32.vlgmr.msra.gmra.mxu1 %vm754_vm8, %v752_v24  ;;  %p1269_p13 = pneg %p1268_p6 }
 0x127   : > { %1057 = vmatmul.msk.f32.vlgmr.msra.gmra.mxu2 %vm754_vm8, %v752_v24  ;;  %1059 = vmatmul.msk.f32.vlgmr.msra.gmra.mxu3 %vm754_vm8, %v752_v24 }
 0x128   : > { %p1274_p8 = pnand %p1273_p7, %p1269_p13 }
 0x12e   : > { %1054 = vmatmul.msk.f32.gmra.mxu0 %vm754_vm8, %v753_v25  ;;  %1056 = vmatmul.msk.f32.gmra.mxu1 %vm754_vm8, %v753_v25 }
 0x12f   : > { %1058 = vmatmul.msk.f32.gmra.mxu2 %vm754_vm8, %v753_v25  ;;  %1060 = vmatmul.msk.f32.gmra.mxu3 %vm754_vm8, %v753_v25 }
 0x167   : > { %v858_v3 = vpop.permute.xlu0 %857 }
 0x168   : > { %v865_v4 = vrot.slane %v858_v3, 4 }
 0x169   : > { %v863_v31 = vpop.permute.xlu1 %862 }
 0x16a   : > { %v866_v43 = vrot.slane %v863_v31, 4 }
 0x16c   : > { %v867_v5 = vsel %vm864_vm9, %v865_v4, %v866_v43 }
 0x16d   : > { %v869_v35 = vadd.f32 %v867_v5, %v278_v32  ;;  %v870_v53 = vadd.f32 %v867_v5, %v279_v42  ;;  %v871_v36 = vadd.f32 %v867_v5, %v280_v2  ;;  %v872_v28 = vadd.f32 %v867_v5, %v281_v33 }
 0x16f   : > { %v877_v30 = vrot.slane %v869_v35, 4  ;;  %v878_v34 = vrot.slane %v870_v53, 4  ;;  %v879_v37 = vrot.slane %v871_v36, 4  ;;  %v880_v38 = vrot.slane %v872_v28, 4 }
 0x171   : > { %v913_v39 = vsel %vm864_vm9, %v858_v3, %v877_v30  ;;  %v914_v41 = vsel %vm864_vm9, %v858_v3, %v878_v34  ;;  %v915_v44 = vsel %vm864_vm9, %v858_v3, %v879_v37  ;;  %v916_v47 = vsel %vm864_vm9, %v858_v3, %v880_v38 }
 0x172   : > { %v921_v49 = vpack.c.bf16 %v914_v41, %v913_v39  ;;  %v922_v6 = vpack.c.bf16 %v916_v47, %v915_v44 }
 0x174   : > { %927 = vst [vmem:[%s1733_s9] sm:$0xff] %v921_v49 }
 0x175   : > { %928 = vst [vmem:[%s1733_s9 + $0x8] sm:$0xff] %v922_v6 }
 0x1a3   : > { %v778_v48 = vpop.f32.mrf.mxu0  ;;  %v801_v54 = vpop.f32.mrf.mxu1 }
 0x1a4   : > { %v893_v55 = vrot.slane %v778_v48, 4  ;;  %v894_v56 = vrot.slane %v801_v54, 4 }
 0x1a6   : > { %v917_v57 = vsel %vm864_vm9, %v877_v30, %v893_v55  ;;  %v918_v59 = vsel %vm864_vm9, %v878_v34, %v894_v56 }
 0x1a7   : > { %v923_v60 = vpack.c.bf16 %v918_v59, %v917_v57 }
 0x1a9   : > { %929 = vst [vmem:[%s1733_s9 + $0x10] sm:$0xff] %v923_v60 }
 0x1aa   : > { %v824_v61 = vpop.f32.mrf.mxu2  ;;  %v847_v62 = vpop.f32.mrf.mxu3 }
 0x1ab   : > { %v895_v58 = vrot.slane %v824_v61, 4  ;;  %v896_v63 = vrot.slane %v847_v62, 4  ;;  %v781_v0 = vpop.f32.mrf.mxu0  ;;  %v804_v1 = vpop.f32.mrf.mxu1 }
 0x1ac   : > { %v897_v7 = vrot.slane %v781_v0, 4  ;;  %v899_v14 = vrot.slane %v804_v1, 4 }
 0x1ad   : > { %v919_v15 = vsel %vm864_vm9, %v879_v37, %v895_v58  ;;  %v920_v16 = vsel %vm864_vm9, %v880_v38, %v896_v63 }
 0x1ae   : > { %v924_v17 = vpack.c.bf16 %v920_v16, %v919_v15  ;;  %v898_v8 = vsel %vm864_vm9, %v893_v55, %v897_v7  ;;  %v900_v9 = vsel %vm864_vm9, %v894_v56, %v899_v14 }
 0x1af   : > { %v925_v10 = vpack.c.bf16 %v900_v9, %v898_v8 }
 0x1b0   : > { %930 = vst [vmem:[%s1733_s9 + $0x18] sm:$0xff] %v924_v17 }
 0x1b1   : > { %931 = vst [vmem:[%s1733_s9 + $0x20] sm:$0xff] %v925_v10 }
 0x1b2   : > { %v827_v11 = vpop.f32.mrf.mxu2  ;;  %v850_v12 = vpop.f32.mrf.mxu3 }
 0x1b3   : > { %v901_v13 = vrot.slane %v827_v11, 4  ;;  %v903_v18 = vrot.slane %v850_v12, 4 }
 0x1b5   : > { %v902_v19 = vsel %vm864_vm9, %v895_v58, %v901_v13  ;;  %v904_v20 = vsel %vm864_vm9, %v896_v63, %v903_v18 }
 0x1b6   : > { %v926_v21 = vpack.c.bf16 %v904_v20, %v902_v19 }
 0x1b8   : > { %932 = vst [vmem:[%s1733_s9 + $0x28] sm:$0xff] %v926_v21 }
 0x1b9   : > { %1277 = shalt.err (!%p1274_p8)
}
 0x1ba   : > { %s1328_s13 = smov 256   ;;  %s1329_s15 = smov 1024  }
 0x1bb   : > { %s1330_s17 = smov 16  }
 0x1bc   : > { %1078 = dma.vmem_to_hbm [thread:$0]  (%p1413_p11), %s947_s14, 768, %s949_s22, %s934_s2, %s1328_s13, %s1329_s15, %s1330_s17  }
 0x1bd PF: > { %p1100_p9 = scmp.ge.s32.totalorder %s1320_s21, 2  ;;  %s963_s23 = sand.u32 1, %s1308_s18  }
 0x1be   : > { %s964_s9 = scalar_lea.sflag [#allocation4], %s963_s23 }
 0x1bf   : > { %p1092_p10 = pnand %p1100_p9, %p1417_p12 }
 0x1c1   : > { %p1093_p1 = pneg %p1092_p10 }
 0x1c3   : > { %1303 = dma.done.wait (%p1093_p1), %s964_s9, 768  }
 0x1c4   : > { %1305 = vsyncadd (%p1093_p1), %s964_s9, 4294966528  ;;  %p19_p0 = scmp.ge.s32.totalorder %s1386_s24, 6   ;;  %s1798_s18 = smov %s1312_s19 }
 0x1c5   : > { %s1799_s19 = smov %s1316_s20  ;;  %s1800_s20 = smov %s1398_s27 }
 0x1c6   : > { %s1801_s21 = smov %s1386_s24  ;;  %21 = sbr.rel (!%p19_p0) target bundleno = 9 (0x9), region = 93 }
 0x1cb   :  { %970 = vsyncpa [#allocation3], 1 }
 0x1cc   :  { %972 = vsyncpa [#allocation3 + $0x1], 1 }
 0x1cd   :  { %973 = vsyncpa [#allocation6], 1 }
 0x1ce   :  { %974 = vsyncpa [#allocation4], 1 }
 0x1cf   :  { %976 = vsyncpa [#allocation4 + $0x1], 1 }

</bundles_post_ra>
